<compile_context>
chip_gen: v5e
topology: v5e:2x2
jax: 0.10.0
libtpu: 0.0.40
codegen_flags: <defaults>
</compile_context>

<pallas_src>
import jax
import jax.numpy as jnp
from jax.experimental import pallas as pl
from jax.experimental.pallas import tpu as pltpu


def _round_up(v, m):
    return (v + m - 1) // m * m


def _surface_net_kernel(x_ref, halo_ref, o_ref):
    # x_ref   : (1, TH, W)     main input row tile (rows [r*TH, r*TH+TH))
    # halo_ref: (1, 8,  W)     next 8 input rows (only the first 2 are used)
    # o_ref   : (1, 3, TH, Wo) normal planes for output rows [r*TH, r*TH+TH)
    a = x_ref[0]                                   # (TH, W)
    h = halo_ref[0]                                # (8,  W)
    th, _ = a.shape
    wo = o_ref.shape[-1]

    # (TH + 8)-row working window; rows [TH, TH+2) are the vertical halo.
    # Rows that read padded / halo garbage only feed output rows >= Ho, which
    # are masked at writeback (ragged last row tile).
    win = jnp.concatenate([a, h], axis=0)          # (TH+8, W)

    top = win[0:th, :]                             # input row i     (output row i)
    mid = win[1:th + 1, :]                         # input row i + 1
    bot = win[2:th + 2, :]                         # input row i + 2

    # Central differences of the 3x3 "valid" conv, already shifted so output
    # column j corresponds to input column j + 1 (crop folded in).
    dzdx = mid[:, 2:2 + wo] - mid[:, 0:wo]         # x[i+1, j+2] - x[i+1, j]
    dzdy = (bot - top)[:, 1:1 + wo]                # x[i+2, j+1] - x[i,   j+1]

    # ||n|| = sqrt(dzdx^2 + dzdy^2 + 1); fold the minus sign into the scale.
    inv = jax.lax.rsqrt(dzdx * dzdx + dzdy * dzdy + jnp.float32(1.0))
    neg_inv = -inv

    o_ref[0, 0] = dzdx * neg_inv                   # -dzdx / ||n||
    o_ref[0, 1] = dzdy * neg_inv                   # -dzdy / ||n||
    o_ref[0, 2] = inv                              #     1 / ||n||


def surface_net(x, *, tile_rows=128):
    """x: (N, 1, H, W) float32 -> (N, 1, 3, H-2, W-2) float32."""
    N, C, H, W = x.shape
    assert C == 1, "SurfaceNet expects a single (depth) channel"
    assert H >= 3 and W >= 3, "SurfaceNet needs H >= 3 and W >= 3"
    Ho, Wo = H - 2, W - 2

    # Row-tile height: multiple of 8 (sublane quantum), capped by the map.
    TH = min(_round_up(tile_rows, 8), _round_up(Ho, 8))
    RT = pl.cdiv(Ho, TH)
    K = TH // 8                       # main-tile height in 8-row blocks
    HB_LAST = pl.cdiv(H, 8) - 1       # last valid 8-row block of the input

    xs = x[:, 0]                      # (N, H, W); size-1 squeeze, no copy

    def main_map(n, r):
        return (n, r, 0)

    def halo_map(n, r):
        # First 8-row block at/after the end of the main tile.  Clamped so a
        # fully out-of-range block index is never emitted; whenever the clamp
        # triggers, no valid output row of this tile needs the halo.
        return (n, jnp.minimum((r + 1) * K, HB_LAST), 0)

    def out_map(n, r):
        return (n, 0, r, 0)

    cost = pl.CostEstimate(
        flops=int(10 * N * Ho * Wo),
        transcendentals=int(N * Ho * Wo),
        bytes_accessed=int(4 * N * (H * W + 3 * Ho * Wo)),
    )

    out = pl.pallas_call(
        _surface_net_kernel,
        out_shape=jax.ShapeDtypeStruct((N, 3, Ho, Wo), x.dtype),
        grid=(N, RT),
        in_specs=[
            pl.BlockSpec((1, TH, W), main_map),   # main row tile
            pl.BlockSpec((1, 8, W), halo_map),    # 8-row halo view of same x
        ],
        out_specs=pl.BlockSpec((1, 3, TH, Wo), out_map),
        compiler_params=pltpu.CompilerParams(
            dimension_semantics=("parallel", "parallel"),
            vmem_limit_bytes=32 * 1024 * 1024,
        ),
        cost_estimate=cost,
    )(xs, xs)                          # same array read twice (tile + halo)

    return out[:, None]                # (N, 1, 3, Ho, Wo)


def _surface_net_reference(x):
    """Pure-JAX reference mirroring the PyTorch forward (in float32)."""
    dzdx = x[:, :, 1:-1, 2:] - x[:, :, 1:-1, :-2]
    dzdy = x[:, :, 2:, 1:-1] - x[:, :, :-2, 1:-1]
    dz = jnp.ones_like(dzdy)
    n = jnp.stack((-dzdx, -dzdy, dz), axis=2)
    return n / jnp.linalg.norm(n, axis=2, keepdims=True)


if __name__ == "__main__":
    key = jax.random.PRNGKey(0)
    k1, k2 = jax.random.split(key)

    # Main test: small depth-map batch (N, 1, H, W).  The nn.Conv2d layers of
    # the PyTorch module are unused in forward, so no parameters are needed.
    x = jax.random.normal(k1, (2, 1, 16, 16), jnp.float32)
    out = jax.block_until_ready(surface_net(x))
    ref = _surface_net_reference(x)
    assert out.shape == (2, 1, 3, 14, 14), out.shape
    assert jnp.allclose(out, ref, atol=1e-5, rtol=1e-5), "mismatch vs reference"

    # Second test: odd sizes + forced row tiling (RT > 1) to exercise the
    # halo view and the ragged last row/lane tiles.
    x2 = jax.random.normal(k2, (1, 1, 21, 19), jnp.float32)
    out2 = jax.block_until_ready(surface_net(x2, tile_rows=8))
    ref2 = _surface_net_reference(x2)
    assert out2.shape == (1, 1, 3, 19, 17), out2.shape
    assert jnp.allclose(out2, ref2, atol=1e-5, rtol=1e-5), "tiled-path mismatch"

    print("KERNEL_OK")
</pallas_src>

<mosaic_0001>
module attributes {stable_mosaic.version = 11 : i64} {
  func.func @_surface_net_kernel(%arg0: i32, %arg1: i32, %arg2: memref<1x16x16xf32, #tpu.memory_space<vmem>>, %arg3: memref<1x8x16xf32, #tpu.memory_space<vmem>>, %arg4: memref<1x3x16x14xf32, #tpu.memory_space<vmem>>) attributes {dimension_semantics = [#tpu.dimension_semantics<parallel>, #tpu.dimension_semantics<parallel>], iteration_bounds = array<i64: 2, 1>, scalar_prefetch = 0 : i64, scratch_operands = 0 : i64, tpu.core_type = #tpu.core_type<tc>, window_params = [{transform_indices = @transform_0, window_bounds = array<i64: 1, 16, 16>}, {transform_indices = @transform_1, window_bounds = array<i64: 1, 8, 16>}, {transform_indices = @transform_2, window_bounds = array<i64: 1, 3, 16, 14>}]} {
    %c0 = arith.constant 0 : index
    %c0_0 = arith.constant 0 : index
    %c0_1 = arith.constant 0 : index
    %0 = vector.load %arg2[%c0, %c0_0, %c0_1] : memref<1x16x16xf32, #tpu.memory_space<vmem>>, vector<1x16x16xf32>
    %1 = vector.shape_cast %0 : vector<1x16x16xf32> to vector<16x16xf32>
    %c0_2 = arith.constant 0 : index
    %c0_3 = arith.constant 0 : index
    %c0_4 = arith.constant 0 : index
    %2 = vector.load %arg3[%c0_2, %c0_3, %c0_4] : memref<1x8x16xf32, #tpu.memory_space<vmem>>, vector<1x8x16xf32>
    %3 = vector.shape_cast %2 : vector<1x8x16xf32> to vector<8x16xf32>
    %4 = tpu.concatenate %1, %3 in 0 : vector<16x16xf32>, vector<8x16xf32> -> vector<24x16xf32>
    %5 = vector.extract_strided_slice %4 {offsets = [0, 0], sizes = [16, 16], strides = [1, 1]} : vector<24x16xf32> to vector<16x16xf32>
    %6 = vector.extract_strided_slice %4 {offsets = [1, 0], sizes = [16, 16], strides = [1, 1]} : vector<24x16xf32> to vector<16x16xf32>
    %7 = vector.extract_strided_slice %4 {offsets = [2, 0], sizes = [16, 16], strides = [1, 1]} : vector<24x16xf32> to vector<16x16xf32>
    %8 = vector.extract_strided_slice %6 {offsets = [0, 2], sizes = [16, 14], strides = [1, 1]} : vector<16x16xf32> to vector<16x14xf32>
    %9 = vector.extract_strided_slice %6 {offsets = [0, 0], sizes = [16, 14], strides = [1, 1]} : vector<16x16xf32> to vector<16x14xf32>
    %10 = arith.subf %8, %9 : vector<16x14xf32>
    %11 = arith.subf %7, %5 : vector<16x16xf32>
    %12 = vector.extract_strided_slice %11 {offsets = [0, 1], sizes = [16, 14], strides = [1, 1]} : vector<16x16xf32> to vector<16x14xf32>
    %13 = arith.mulf %10, %10 : vector<16x14xf32>
    %14 = arith.mulf %12, %12 : vector<16x14xf32>
    %15 = arith.addf %13, %14 : vector<16x14xf32>
    %cst = arith.constant 1.000000e+00 : f32
    %16 = vector.broadcast %cst : f32 to vector<16x14xf32>
    %17 = arith.addf %15, %16 : vector<16x14xf32>
    %18 = math.rsqrt %17 : vector<16x14xf32>
    %cst_5 = arith.constant 0.000000e+00 : f32
    %19 = vector.broadcast %cst_5 : f32 to vector<16x14xf32>
    %20 = arith.subf %19, %18 : vector<16x14xf32>
    %21 = arith.mulf %10, %20 : vector<16x14xf32>
    %c0_6 = arith.constant 0 : index
    %c0_7 = arith.constant 0 : index
    %c0_8 = arith.constant 0 : index
    %c0_9 = arith.constant 0 : index
    %22 = vector.load %arg4[%c0_6, %c0_7, %c0_8, %c0_9] : memref<1x3x16x14xf32, #tpu.memory_space<vmem>>, vector<1x1x16x14xf32>
    %23 = vector.shape_cast %22 : vector<1x1x16x14xf32> to vector<16x14xf32>
    %24 = vector.shape_cast %21 : vector<16x14xf32> to vector<1x1x16x14xf32>
    tpu.vector_store %arg4[%c0_6, %c0_7, %c0_8, %c0_9], %24 {strides = array<i32>} : memref<1x3x16x14xf32, #tpu.memory_space<vmem>>, vector<1x1x16x14xf32>,
    %25 = arith.mulf %12, %20 : vector<16x14xf32>
    %c0_10 = arith.constant 0 : index
    %c1 = arith.constant 1 : index
    %c0_11 = arith.constant 0 : index
    %c0_12 = arith.constant 0 : index
    %26 = vector.load %arg4[%c0_10, %c1, %c0_11, %c0_12] : memref<1x3x16x14xf32, #tpu.memory_space<vmem>>, vector<1x1x16x14xf32>
    %27 = vector.shape_cast %26 : vector<1x1x16x14xf32> to vector<16x14xf32>
    %28 = vector.shape_cast %25 : vector<16x14xf32> to vector<1x1x16x14xf32>
    tpu.vector_store %arg4[%c0_10, %c1, %c0_11, %c0_12], %28 {strides = array<i32>} : memref<1x3x16x14xf32, #tpu.memory_space<vmem>>, vector<1x1x16x14xf32>,
    %c0_13 = arith.constant 0 : index
    %c2 = arith.constant 2 : index
    %c0_14 = arith.constant 0 : index
    %c0_15 = arith.constant 0 : index
    %29 = vector.load %arg4[%c0_13, %c2, %c0_14, %c0_15] : memref<1x3x16x14xf32, #tpu.memory_space<vmem>>, vector<1x1x16x14xf32>
    %30 = vector.shape_cast %29 : vector<1x1x16x14xf32> to vector<16x14xf32>
    %31 = vector.shape_cast %18 : vector<16x14xf32> to vector<1x1x16x14xf32>
    tpu.vector_store %arg4[%c0_13, %c2, %c0_14, %c0_15], %31 {strides = array<i32>} : memref<1x3x16x14xf32, #tpu.memory_space<vmem>>, vector<1x1x16x14xf32>,
    return
  }
  func.func @transform_0(%arg0: i32, %arg1: i32) -> (i32, i32, i32) {
    %c0_i32 = arith.constant 0 : i32
    %c0_i32_0 = arith.constant 0 : i32
    return %arg0, %arg1, %c0_i32 : i32, i32, i32
  }
  func.func @transform_1(%arg0: i32, %arg1: i32) -> (i32, i32, i32) {
    %c1_i32 = arith.constant 1 : i32
    %0 = arith.addi %arg1, %c1_i32 : i32
    %c2_i32 = arith.constant 2 : i32
    %1 = arith.muli %0, %c2_i32 : i32
    %c1_i32_0 = arith.constant 1 : i32
    %2 = arith.minsi %1, %c1_i32_0 : i32
    %c0_i32 = arith.constant 0 : i32
    %c0_i32_1 = arith.constant 0 : i32
    return %arg0, %2, %c0_i32 : i32, i32, i32
  }
  func.func @transform_2(%arg0: i32, %arg1: i32) -> (i32, i32, i32, i32) {
    %c0_i32 = arith.constant 0 : i32
    %c0_i32_0 = arith.constant 0 : i32
    %c0_i32_1 = arith.constant 0 : i32
    return %arg0, %c0_i32, %arg1, %c0_i32_0 : i32, i32, i32, i32
  }
}

</mosaic_0001>

<bundles_post_ra>
// kernel: tpu_custom_call.1
= control target key start
LH: loop header
LB: loop body
LE: loop exit
PB: predicated region body
PF: predicated region fallthrough
CT: control target
= control target key end

     0   :  { %7 = vsyncpa [#allocation3], 0  ;;  %s929_s0 = inlined_call_operand.hbm [shape: f32[2,16,16], index: 0, kind: input, shape index: {}]   ;;  %s930_s1 = inlined_call_operand.hbm [shape: f32[2,16,16], index: 1, kind: input, shape index: {}]   ;;  %s931_s2 = inlined_call_operand.vmem [shape: f32[2,3,14,14], index: 2, kind: output, shape index: {}]  }
   0x1   :  { %9 = vsyncpa [#allocation3 + $0x1], 0 }
   0x2   :  { %10 = vsyncpa [#allocation5], 0 }
   0x3   :  { %12 = vsyncpa [#allocation5 + $0x1], 0  ;;  %s776_s9 = smov 0   ;;  %s778_s10 = smov 0  }
   0x4   :  { %s780_s11 = smov 0   ;;  %s782_s12 = smov 0  }
   0x5   :  { %s784_s13 = smov 0   ;;  %s786_s14 = smov 0  }
   0x6 LB: > { %s540_s15 = sadd.s32 4294967295, %s753_s14   ;;  %s30_s16 = sadd.s32 1, %s749_s13  ;;  %s753_s14 = sphi %s786_s14, %s18_s14   ;;  %s749_s13 = sphi %s784_s13, %s939_s13   ;;  %s745_s12 = sphi %s782_s12, %s938_s12   ;;  %s741_s11 = sphi %s780_s11, %s937_s11   ;;  %s737_s10 = sphi %s778_s10, %s936_s10   ;;  %s733_s9 = sphi %s776_s9, %s935_s9  }
   0x7   : > { %p32_p0 = scmp.ge.s32.totalorder %s30_s16, 2  ;;  %s39_s17 = sadd.s32 1, %s741_s11 }
   0x8   : > { %p46_p1 = scmp.ne.s32.totalorder %s741_s11, %s737_s10  ;;  %p47_p2 = scmp.eq.s32.totalorder %s753_s14, 0 }
   0x9   : > { %s941_s16 = smov (%p32_p0, %s30_s16), 0  ;;  %p52_p4 = scmp.ne.s32.totalorder %s737_s10, %s733_s9 }
   0xa   : > { %p812_p3 = por %p47_p2, %p46_p1  ;;  %s34_s19 = ssub.s32 %s749_s13, %s941_s16 }
   0xb   : > { %p53_p5 = scmp.eq.s32.totalorder %s540_s15, 0  ;;  %p37_p6 = scmp.eq.s32.totalorder %s34_s19, 0 }
   0xc   : > { %p578_p8 = scmp.lt.s32.totalorder %s753_s14, 2  ;;  %s140_s22 = sand.u32 1, %s741_s11  }
   0xd   : > { %p819_p7 = por %p53_p5, %p52_p4  ;;  %s562_s23 = sshll.u32 %s749_s13, 4 }
   0xe   : > { %s825_s21 = scalar_select %p37_p6, %s741_s11, %s39_s17  }
   0xf   : > { %s544_s24 = sshll.u32 %s140_s22, 4  ;;  %s151_s27 = scalar_lea.hbm %s929_s0, %s562_s23 }
  0x10   : > { %s152_s28 = sshll.u32 %s151_s27, 4  ;;  %s144_s29 = scalar_lea.vmem [#allocation2], %s544_s24  ;;  %s153_s28 = int_to_ptr.hbm [resolvable:$true] %s152_s28 }
  0x11   : > { %s154_s30 = sshll.u32 %s144_s29, 4  ;;  %p834_p9 = pnand %p578_p8, %p812_p3  ;;  %s155_s30 = int_to_ptr.vmem [resolvable:$true] %s154_s30 }
  0x12   : > { %p550_p10 = scmp.ge.s32.totalorder %s753_s14, 1  ;;  %p187_p11 = scmp.lt.s32.totalorder %s753_s14, 3 }
  0x13   : > { %s141_s4 = scalar_lea.sflag [#allocation3], %s140_s22  ;;  %s755_s5 = smov 128  }
  0x14   : > { %s756_s6 = smov 8   ;;  %p188_p12 = pnand %p550_p10, %p187_p11 }
  0x15   : > { %574 = dma.hbm_to_vmem [thread:$0]  (!%p834_p9), %s153_s28, 256, %s155_s30, %s141_s4, %s755_s5, %s755_s5, %s756_s6  }
  0x16   : > { %s547_s7 = sshll.u32 %s140_s22, 3  ;;  %s564_s8 = sadd.s32 8, %s562_s23 }
  0x17   : > { %s178_s17 = scalar_lea.hbm %s930_s1, %s564_s8  ;;  %s168_s19 = scalar_lea.vmem [#allocation4], %s547_s7 }
  0x18   : > { %s180_s18 = sshll.u32 %s178_s17, 4  ;;  %s182_s24 = sshll.u32 %s168_s19, 4  ;;  %s181_s18 = int_to_ptr.hbm [resolvable:$true] %s180_s18  ;;  %s183_s24 = int_to_ptr.vmem [resolvable:$true] %s182_s24 }
  0x19   : > { %s165_s25 = scalar_lea.sflag [#allocation5], %s140_s22  ;;  %191 = sbr.rel (%p188_p12) target bundleno = 431 (0x1af), region = 28 }
  0x1a   : > { %577 = dma.hbm_to_vmem [thread:$0]  (!%p834_p9), %s181_s18, 128, %s183_s24, %s165_s25  }
  0x1b   : > { %s193_s26 = sand.u32 (!%p188_p12), 1, %s737_s10  }
  0x1c   : > { %s551_s27 = sshll.u32 (!%p188_p12), %s193_s26, 4  ;;  %s194_s28 = scalar_lea.sflag (!%p188_p12), [#allocation3], %s193_s26 }
  0x1d   : > { %s197_s29 = scalar_lea.vmem (!%p188_p12), [#allocation2], %s551_s27 }
  0x1e   : > { %724 = dma.done.wait (%p819_p7), %s194_s28, 256  }
  0x1f   : > { %726 = vsyncadd (%p819_p7), %s194_s28, 4294967040  ;;  %s552_s23 = sshll.u32 %s193_s26, 3  ;;  %s204_s30 = scalar_lea.sflag [#allocation5], %s193_s26 }
  0x20   : > { %s207_s4 = scalar_lea.vmem [#allocation4], %s552_s23 }
  0x21   : > { %728 = dma.done.wait (%p819_p7), %s204_s30, 128  }
  0x22   : > { %730 = vsyncadd (%p819_p7), %s204_s30, 4294967168  ;;  %v255_v0 = vld [vmem:[%s207_s4] sm:$0xff]  ;;  %v254_v2 = vld [vmem:[%s197_s29 + $0x8] sm:$0xff]  ;;  %vm271_vm0 = vcmask 1041408   ;;  %s757_s22 = smov 2   ;;  %vm290_vm1 = vcmask 1046528  }
  0x23   : > { %v253_v1 = vld [vmem:[%s197_s29] sm:$0xff]  ;;  %263 = vrot.lane.b32.xlu1 %v255_v0, %s757_s22  ;;  %v273_v4 = vrot.slane %v254_v2, 6  ;;  %s758_s20 = smov 1   ;;  %vm368_vm11 = vcmask 1040384   ;;  %s759_s3 = smov 127   ;;  %vm363_vm12 = vcmask 106496  }
  0x24   : > { %259 = vrot.lane.b32.xlu0 %v253_v1, %s757_s22  ;;  %v272_v3 = vrot.slane %v253_v1, 6  ;;  %s760_s5 = smov 126   ;;  %p244_p13 = scmp.lt.s32.totalorder %s745_s12, 1  ;;  %vm359_vm13 = vcmask 113665   ;;  %vm361_vm14 = vcmask 113664   ;;  %vm402_vm15 = vcmask 107520  }
  0x25   : > { %v858_v7 = vsub.f32 %v255_v0, %v273_v4 }
  0x26   : > { %v856_v5 = vsub.f32 %v253_v1, %v272_v3  ;;  %v274_v6 = vsel %vm271_vm0, %v272_v3, %v273_v4  ;;  %s943_s12 = smov (!%p244_p13, %s745_s12), 1  ;;  %vm399_vm0 = vcmask 113666  }
  0x27   : > { %v860_v8 = vsub.f32 %v254_v2, %v274_v6  ;;  %v286_v10 = vmul.f32 %v858_v7, %v858_v7  ;;  %s566_s6 = smul.u32 48, %s943_s12 }
  0x28   : > { %v284_v9 = vmul.f32 %v856_v5, %v856_v5 }
  0x29   : > { %v285_v11 = vmul.f32 %v860_v8, %v860_v8  ;;  %v294_v13 = vrot.slane %v286_v10, 1  ;;  %s886_s9 = scalar_lea.vmem %s931_s2, %s566_s6 }
  0x2a   : > { %v291_v12 = vrot.slane %v284_v9, 1 }
  0x2b   : > { %v292_v14 = vrot.slane %v285_v11, 1 }
  0x2c   : > { %261 = vrot.lane.b32.xlu0 %v254_v2, %s757_s22 }
  0x2d   : > { %v293_v15 = vsel %vm290_vm1, %v291_v12, %v292_v14  ;;  %v295_v16 = vsel %vm290_vm1, %v292_v14, %v294_v13 }
  0x2e   : > { %296 = vrot.lane.b32.xlu1 %v293_v15, %s758_s20  ;;  %298 = vrot.lane.b32.xlu2 %v295_v16, %s758_s20 }
  0x36   : > { %300 = vrot.lane.b32.xlu2 %v294_v13, %s758_s20 }
  0x88   : > { %v299_v17 = vpop.permute.xlu2 %298 }
  0x90   : > { %v301_v21 = vpop.permute.xlu2 %300 }
  0x95   : > { %v264_v18 = vpop.permute.xlu1 %263 }
  0x96   : > { %v260_v19 = vpop.permute.xlu0 %259  ;;  %v868_v20 = vsub.f32 %v255_v0, %v264_v18 }
  0x97   : > { %v268_v23 = vsub.f32 %v253_v1, %v260_v19 }
  0x98   : > { %v283_v22 = vmul.f32 %v868_v20, %v868_v20 }
  0x99   : > { %v281_v28 = vmul.f32 %v268_v23, %v268_v23 }
  0x9a   : > { %v307_v24 = vadd.f32 %v301_v21, %v283_v22 }
  0x9c   : > { %v310_v25 = vadd.f32 1.0, %v307_v24 }
  0x9e   : > { %v262_v26 = vpop.permute.xlu0 %261  ;;  %633 = vrsqrt.f32 %v310_v25  ;;  %vm337_vm3 = vweird.f32 %v310_v25 }
  0x9f   : > { %v269_v27 = vsub.f32 %v254_v2, %v262_v26 }
  0xa0   : > { %v297_v29 = vpop.permute.xlu1 %296 }
  0xa1   : > { %v282_v30 = vmul.f32 %v269_v27, %v269_v27  ;;  %v305_v31 = vadd.f32 %v297_v29, %v281_v28 }
  0xa3   : > { %v306_v32 = vadd.f32 %v299_v17, %v282_v30  ;;  %v308_v33 = vadd.f32 1.0, %v305_v31 }
  0xa4   : > { %v634_v34 = vpop.eup %633 }
  0xa5   : > { %v309_v35 = vadd.f32 1.0, %v306_v32  ;;  %635 = vrsqrt.f32 %v308_v33  ;;  %v332_v36 = vmul.f32 %v634_v34, %v310_v25  ;;  %vm338_vm2 = vweird.f32 %v634_v34 }
  0xa6   : > { %vm339_vm5 = vmor %vm337_vm3, %vm338_vm2  ;;  %vm317_vm6 = vweird.f32 %v308_v33 }
  0xa7   : > { %637 = vrsqrt.f32 %v309_v35  ;;  %v333_v37 = vmul.f32 %v634_v34, %v332_v36  ;;  %vm327_vm9 = vweird.f32 %v309_v35 }
  0xa9   : > { %v334_v38 = vmul.f32 0.5, %v333_v37 }
  0xab   : > { %v636_v39 = vpop.eup %635  ;;  %v335_v40 = vsub.f32 1.5, %v334_v38 }
  0xac   : > { %v312_v41 = vmul.f32 %v636_v39, %v308_v33  ;;  %vm318_vm4 = vweird.f32 %v636_v39 }
  0xad   : > { %v638_v42 = vpop.eup %637  ;;  %v336_v45 = vmul.f32 %v634_v34, %v335_v40  ;;  %vm319_vm8 = vmor %vm317_vm6, %vm318_vm4 }
  0xae   : > { %v322_v43 = vmul.f32 %v638_v42, %v309_v35  ;;  %v313_v44 = vmul.f32 %v636_v39, %v312_v41  ;;  %vm328_vm7 = vweird.f32 %v638_v42 }
  0xaf   : > { %v340_v50 = vsel %vm339_vm5, %v634_v34, %v336_v45  ;;  %vm329_vm10 = vmor %vm327_vm9, %vm328_vm7 }
  0xb0   : > { %v323_v46 = vmul.f32 %v638_v42, %v322_v43  ;;  %v314_v47 = vmul.f32 0.5, %v313_v44  ;;  %v343_v56 = vsub.f32 0.0, %v340_v50 }
  0xb2   : > { %v324_v48 = vmul.f32 0.5, %v323_v46  ;;  %v315_v49 = vsub.f32 1.5, %v314_v47  ;;  %v372_v61 = vrot.slane %v343_v56, 7  ;;  %v346_v2 = vmul.f32 %v343_v56, %v868_v20 }
  0xb4   : > { %v325_v51 = vsub.f32 1.5, %v324_v48  ;;  %v316_v52 = vmul.f32 %v636_v39, %v315_v49 }
  0xb6   : > { %v326_v53 = vmul.f32 %v638_v42, %v325_v51  ;;  %v320_v54 = vsel %vm319_vm8, %v636_v39, %v316_v52 }
  0xb7   : > { %v341_v55 = vsub.f32 0.0, %v320_v54 }
  0xb8   : > { %v330_v57 = vsel %vm329_vm10, %v638_v42, %v326_v53 }
  0xb9   : > { %v342_v58 = vsub.f32 0.0, %v330_v57  ;;  %v369_v59 = vrot.slane %v341_v55, 7  ;;  %v344_v0 = vmul.f32 %v341_v55, %v268_v23 }
  0xbb   : > { %374 = vrot.lane.b32.xlu0 %v369_v59, %s759_s3  ;;  %v370_v60 = vrot.slane %v342_v58, 7  ;;  %v345_v1 = vmul.f32 %v342_v58, %v269_v27 }
  0xbd   : > { %v373_v62 = vsel %vm368_vm11, %v370_v60, %v372_v61  ;;  %v371_v63 = vsel %vm368_vm11, %v369_v59, %v370_v60 }
  0xbe   : > { %378 = vrot.lane.b32.xlu2 %v373_v62, %s759_s3  ;;  %376 = vrot.lane.b32.xlu1 %v371_v63, %s759_s3 }
  0xc3   : > { %350 = vrot.lane.b32.xlu0 %v344_v0, %s760_s5 }
  0xc6   : > { %354 = vrot.lane.b32.xlu2 %v346_v2, %s760_s5  ;;  %352 = vrot.lane.b32.xlu1 %v345_v1, %s760_s5 }
 0x118   : > { %v379_v3 = vpop.permute.xlu2 %378 }
 0x119   : > { %v385_v4 = vmul.f32 %v379_v3, %v858_v7 }
 0x11b   : > { %393 = vrot.lane.b32.xlu2 %v385_v4, %s759_s3 }
 0x120   : > { %v355_v6 = vpop.permute.xlu2 %354 }
 0x121   : > { %364 = vst.msk [vmem:[%s886_s9 + $0xf] sm:$0x1] %vm363_vm12, %v355_v6 }
 0x123   : > { %411 = vrot.lane.b32.xlu2 %v340_v50, %s760_s5 }
 0x12d   : > { %v375_v9 = vpop.permute.xlu0 %374 }
 0x12e   : > { %v383_v7 = vmul.f32 %v375_v9, %v856_v5 }
 0x130   : > { %v377_v10 = vpop.permute.xlu1 %376  ;;  %389 = vrot.lane.b32.xlu0 %v383_v7, %s759_s3 }
 0x131   : > { %v384_v11 = vmul.f32 %v377_v10, %v860_v8 }
 0x133   : > { %391 = vrot.lane.b32.xlu1 %v384_v11, %s759_s3 }
 0x135   : > { %v351_v12 = vpop.permute.xlu0 %350 }
 0x136   : > { %360 = vst.msk [vmem:[%s886_s9 - $0x1] sm:$0xfe] %vm359_vm13, %v351_v12 }
 0x138   : > { %v353_v13 = vpop.permute.xlu1 %352  ;;  %407 = vrot.lane.b32.xlu0 %v320_v54, %s760_s5 }
 0x139   : > { %362 = vst.msk [vmem:[%s886_s9 + $0x7] sm:$0xff] %vm361_vm14, %v353_v13 }
 0x13b   : > { %409 = vrot.lane.b32.xlu1 %v330_v57, %s760_s5 }
 0x175   : > { %v394_v5 = vpop.permute.xlu2 %393 }
 0x176   : > { %556 = vst.msk [vmem:[%s886_s9 + $0x1e] sm:$0x3] %vm402_vm15, %v394_v5 }
 0x17d   : > { %v412_v8 = vpop.permute.xlu2 %411 }
 0x17e   : > { %559 = vst.msk [vmem:[%s886_s9 + $0x2f] sm:$0x1] %vm363_vm12, %v412_v8 }
 0x1a2   : > { %v390_v14 = vpop.permute.xlu0 %389 }
 0x1a3   : > { %554 = vst.msk [vmem:[%s886_s9 + $0xe] sm:$0xfc] %vm399_vm0, %v390_v14 }
 0x1a5   : > { %v392_v15 = vpop.permute.xlu1 %391 }
 0x1a6   : > { %555 = vst.msk [vmem:[%s886_s9 + $0x16] sm:$0xff] %vm361_vm14, %v392_v15 }
 0x1aa   : > { %v408_v16 = vpop.permute.xlu0 %407 }
 0x1ab   : > { %557 = vst.msk [vmem:[%s886_s9 + $0x1f] sm:$0xfe] %vm359_vm13, %v408_v16 }
 0x1ad   : > { %v410_v17 = vpop.permute.xlu1 %409 }
 0x1ae   : > { %558 = vst.msk [vmem:[%s886_s9 + $0x27] sm:$0xff] %vm361_vm14, %v410_v17 }
 0x1af PF: > { %s18_s14 = sadd.s32 1, %s753_s14   ;;  %s935_s9 = smov %s737_s10 }
 0x1b0   : > { %p15_p0 = scmp.ge.s32.totalorder %s18_s14, 4   ;;  %s936_s10 = smov %s741_s11 }
 0x1b1   : > { %s937_s11 = smov %s825_s21  ;;  %s938_s12 = smov %s749_s13 }
 0x1b2   : > { %s939_s13 = smov %s941_s16  ;;  %17 = sbr.rel (!%p15_p0) target bundleno = 6 (0x6), region = 83 }
 0x1b7   :  { %450 = vsyncpa [#allocation3], 1 }
 0x1b8   :  { %452 = vsyncpa [#allocation3 + $0x1], 1 }
 0x1b9   :  { %453 = vsyncpa [#allocation5], 1 }
 0x1ba   :  { %455 = vsyncpa [#allocation5 + $0x1], 1 }

</bundles_post_ra>
